<compile_context>
chip_gen: v6e
topology: v6e:2x2x1
jax: 0.10.0
libtpu: 0.0.40
codegen_flags: <defaults>
</compile_context>

<pallas_src>
import functools

import jax
import jax.numpy as jnp
from jax.experimental import pallas as pl
from jax.experimental.pallas import tpu as pltpu


_SUB = 256  # rows per in-kernel sub-chunk (keeps h0/h1 in vregs)


def _round_up(x, m):
    return ((x + m - 1) // m) * m


def _mlp_rows(xb, w0, b0, w1, b1, w2, b2):
    """obs -> h0 -> h1 -> act for a chunk of rows.

    Matmuls run in bf16 on the MXU (weights are already bf16); bias adds and
    tanh stay in f32.
    """
    h0 = jnp.tanh(
        jnp.dot(xb.astype(jnp.bfloat16), w0, preferred_element_type=jnp.float32)
        + b0)
    h1 = jnp.tanh(
        jnp.dot(h0.astype(jnp.bfloat16), w1, preferred_element_type=jnp.float32)
        + b1)
    return (jnp.dot(h1.astype(jnp.bfloat16), w2,
                    preferred_element_type=jnp.float32) + b2)


def munet_kernel(x_ref, w0_ref, b0_ref, w1_ref, b1_ref, w2_ref, b2_ref, o_ref,
                 *, sub_rows):
    # Parameters are tiny; load once per grid step. Their block index is
    # constant, so the pipeline does not re-fetch them from HBM.
    w0, b0 = w0_ref[...], b0_ref[...]
    w1, b1 = w1_ref[...], b1_ref[...]
    w2, b2 = w2_ref[...], b2_ref[...]

    block_b = x_ref.shape[0]
    nsub = block_b // sub_rows

    if nsub <= 1:
        # Small tile: single straight-line pass.
        o_ref[...] = _mlp_rows(x_ref[...], w0, b0, w1, b1,
                               w2, b2).astype(o_ref.dtype)
    else:
        # Large tile: walk it in sub_rows-sized chunks so the (rows, 64)
        # intermediates live in vregs instead of round-tripping through VMEM.
        def body(i, carry):
            r0 = pl.multiple_of(i * sub_rows, sub_rows)
            y = _mlp_rows(x_ref[pl.ds(r0, sub_rows), :], w0, b0, w1, b1, w2, b2)
            o_ref[pl.ds(r0, sub_rows), :] = y.astype(o_ref.dtype)
            return carry

        jax.lax.fori_loop(0, nsub, body, 0)


def fold_munet_params(params):
    """One-time parameter transform (outside the hot path).

    Folds the input normalization into (w0, b0) and the output affine into
    (w2, b2), and casts the weight matrices to bf16 for the MXU:

      (x - s) * inv @ W0 + b0  ==  x @ (inv[:,None] * W0) + (b0 - (s*inv) @ W0)
      (h @ W2 + b2) * sc + sh  ==  h @ (W2 * sc) + (b2 * sc + sh)
    """
    inv = 1.0 / (params["in_scale"] + 1e-8)                        # [1, obs]
    w0 = params["w0"] * inv.T                                      # [obs, h0]
    b0 = params["b0"] - (params["in_shift"] * inv) @ params["w0"]  # [1, h0]
    w1, b1 = params["w1"], params["b1"]
    w2 = params["w2"] * params["out_scale"]                        # [h1, act]
    b2 = params["b2"] * params["out_scale"] + params["out_shift"]  # [1, act]
    return dict(
        w0=w0.astype(jnp.bfloat16), b0=b0.astype(jnp.float32),
        w1=w1.astype(jnp.bfloat16), b1=b1.astype(jnp.float32),
        w2=w2.astype(jnp.bfloat16), b2=b2.astype(jnp.float32),
    )


def _pick_tiles(B):
    """Choose (block_b, sub_rows) for the batch grid.

    Small batches run as a single tile (block_b == B, which equals the full
    array dim so any B is legal). Large batches use tiles up to 4096 rows,
    multiples of _SUB, with an even number of grid steps for v7x's 2 TCs.
    Pallas handles a ragged last tile, so B never needs padding.
    """
    if B <= 2 * _SUB:
        return B, B
    nsteps = max(2, pl.cdiv(B, 4096))
    if nsteps % 2:
        nsteps += 1
    block_b = _round_up(pl.cdiv(B, nsteps), _SUB)
    return block_b, _SUB


@jax.jit
def munet_forward(x, folded):
    """Fused MuNet forward pass using pre-folded parameters.

    x: [B, obs_dim] float32
    folded: output of fold_munet_params
    returns [B, act_dim] float32
    """
    B, obs_dim = x.shape
    w0, b0 = folded["w0"], folded["b0"]
    w1, b1 = folded["w1"], folded["b1"]
    w2, b2 = folded["w2"], folded["b2"]
    h0 = w0.shape[1]
    h1 = w1.shape[1]
    act_dim = w2.shape[1]

    block_b, sub_rows = _pick_tiles(B)
    grid = (pl.cdiv(B, block_b),)

    full = lambda i: (0, 0)        # parameters: same (whole) block every step
    tile = lambda i: (i, 0)        # x / out: one batch tile per grid step

    flops = 2 * B * (obs_dim * h0 + h0 * h1 + h1 * act_dim)
    bytes_accessed = (4 * B * (obs_dim + act_dim)
                      + 2 * (obs_dim * h0 + h0 * h1 + h1 * act_dim)
                      + 4 * (h0 + h1 + act_dim))

    # TODO(synk): verify in xprof that the 1-D "parallel" batch grid is
    # actually sharded across both v7x TensorCores; if not, switch to a
    # core_map / core-parallel leading axis.
    out = pl.pallas_call(
        functools.partial(munet_kernel, sub_rows=sub_rows),
        out_shape=jax.ShapeDtypeStruct((B, act_dim), jnp.float32),
        grid_spec=pltpu.PrefetchScalarGridSpec(
            num_scalar_prefetch=0,
            grid=grid,
            in_specs=[
                pl.BlockSpec((block_b, obs_dim), tile),   # x
                pl.BlockSpec((obs_dim, h0), full),        # w0 (folded, bf16)
                pl.BlockSpec((1, h0), full),              # b0 (folded)
                pl.BlockSpec((h0, h1), full),             # w1 (bf16)
                pl.BlockSpec((1, h1), full),              # b1
                pl.BlockSpec((h1, act_dim), full),        # w2 (folded, bf16)
                pl.BlockSpec((1, act_dim), full),         # b2 (folded)
            ],
            out_specs=pl.BlockSpec((block_b, act_dim), tile),
        ),
        compiler_params=pltpu.CompilerParams(
            dimension_semantics=("parallel",)),
        cost_estimate=pl.CostEstimate(
            flops=flops,
            transcendentals=B * (h0 + h1),
            bytes_accessed=bytes_accessed),
    )(x, w0, b0, w1, b1, w2, b2)
    return out


def init_munet_params(key, obs_dim, act_dim, hidden_sizes=(64, 64)):
    """Deterministic init mirroring nn.Linear's U(-1/sqrt(fan_in), 1/sqrt(fan_in)).

    Weights are stored as [in, out] (transposed vs. PyTorch's [out, in]).
    Transformation vectors default to MuNet defaults (shift=0, scale=1).
    """
    ks = jax.random.split(key, 6)
    dims = [obs_dim, hidden_sizes[0], hidden_sizes[1], act_dim]
    params = {}
    for li in range(3):
        fan_in, fan_out = dims[li], dims[li + 1]
        bound = 1.0 / jnp.sqrt(jnp.float32(fan_in))
        w = jax.random.uniform(ks[2 * li], (fan_in, fan_out),
                               minval=-bound, maxval=bound, dtype=jnp.float32)
        b = jax.random.uniform(ks[2 * li + 1], (1, fan_out),
                               minval=-bound, maxval=bound, dtype=jnp.float32)
        params[f"w{li}"] = w
        params[f"b{li}"] = b
    params["in_shift"] = jnp.zeros((1, obs_dim), jnp.float32)
    params["in_scale"] = jnp.ones((1, obs_dim), jnp.float32)
    params["out_shift"] = jnp.zeros((1, act_dim), jnp.float32)
    params["out_scale"] = jnp.ones((1, act_dim), jnp.float32)
    return params


def munet_reference(x, params):
    """Pure-JAX f32 reference of the PyTorch forward pass (unfolded params)."""
    out = (x - params["in_shift"]) / (params["in_scale"] + 1e-8)
    out = jnp.tanh(out @ params["w0"] + params["b0"])
    out = jnp.tanh(out @ params["w1"] + params["b1"])
    out = out @ params["w2"] + params["b2"]
    return out * params["out_scale"] + params["out_shift"]


if __name__ == "__main__":
    key = jax.random.PRNGKey(0)
    k_param, k_x, k_t = jax.random.split(key, 3)

    obs_dim, act_dim = 16, 8
    hidden_sizes = (64, 64)

    params = init_munet_params(k_param, obs_dim, act_dim, hidden_sizes)
    # Non-trivial input/output transforms so the weight-folding path is tested.
    kt = jax.random.split(k_t, 4)
    params["in_shift"] = 0.1 * jax.random.normal(kt[0], (1, obs_dim), jnp.float32)
    params["in_scale"] = 1.0 + 0.2 * jax.random.uniform(kt[1], (1, obs_dim),
                                                        dtype=jnp.float32)
    params["out_shift"] = 0.1 * jax.random.normal(kt[2], (1, act_dim), jnp.float32)
    params["out_scale"] = 1.0 + 0.2 * jax.random.uniform(kt[3], (1, act_dim),
                                                         dtype=jnp.float32)

    folded = fold_munet_params(params)

    # bf16 MXU matmuls -> loosen tolerance vs. the f32 reference.
    ATOL, RTOL = 3e-2, 3e-2

    # Small demo batch (single tile, single chunk).
    x = jax.random.normal(k_x, (16, obs_dim), dtype=jnp.float32)
    out = jax.block_until_ready(munet_forward(x, folded))
    ref = munet_reference(x, params)
    assert out.shape == (16, act_dim)
    assert jnp.allclose(out, ref, atol=ATOL, rtol=RTOL), "mismatch vs reference"

    # Medium, non-multiple-of-16 batch (still single tile; block == full dim).
    x2 = jax.random.normal(k_x, (200, obs_dim), dtype=jnp.float32)
    out2 = jax.block_until_ready(munet_forward(x2, folded))
    ref2 = munet_reference(x2, params)
    assert out2.shape == (200, act_dim)
    assert jnp.allclose(out2, ref2, atol=ATOL, rtol=RTOL), "mismatch vs reference"

    # Larger batch: exercises the multi-step grid (2 "parallel" steps), the
    # ragged masked last tile, and the in-kernel 256-row sub-chunk loop.
    x3 = jax.random.normal(k_x, (2500, obs_dim), dtype=jnp.float32)
    out3 = jax.block_until_ready(munet_forward(x3, folded))
    ref3 = munet_reference(x3, params)
    assert out3.shape == (2500, act_dim)
    assert jnp.allclose(out3, ref3, atol=ATOL, rtol=RTOL), "mismatch vs reference"

    print("KERNEL_OK")
</pallas_src>

<mosaic_0001>
module attributes {stable_mosaic.version = 11 : i64} {
  func.func @munet_kernel(%arg0: i32, %arg1: memref<16x16xf32, #tpu.memory_space<vmem>>, %arg2: memref<16x64xbf16, #tpu.memory_space<vmem>>, %arg3: memref<1x64xf32, #tpu.memory_space<vmem>>, %arg4: memref<64x64xbf16, #tpu.memory_space<vmem>>, %arg5: memref<1x64xf32, #tpu.memory_space<vmem>>, %arg6: memref<64x8xbf16, #tpu.memory_space<vmem>>, %arg7: memref<1x8xf32, #tpu.memory_space<vmem>>, %arg8: memref<16x8xf32, #tpu.memory_space<vmem>>) attributes {dimension_semantics = [#tpu.dimension_semantics<parallel>], iteration_bounds = array<i64: 1>, scalar_prefetch = 0 : i64, scratch_operands = 0 : i64, tpu.core_type = #tpu.core_type<tc>, window_params = [{transform_indices = @transform_0, window_bounds = array<i64: 16, 16>}, {pipeline_mode = #tpu.pipeline_mode<synchronous>, transform_indices = @transform_1, window_bounds = array<i64: 16, 64>}, {pipeline_mode = #tpu.pipeline_mode<synchronous>, transform_indices = @transform_2, window_bounds = array<i64: 1, 64>}, {pipeline_mode = #tpu.pipeline_mode<synchronous>, transform_indices = @transform_3, window_bounds = array<i64: 64, 64>}, {pipeline_mode = #tpu.pipeline_mode<synchronous>, transform_indices = @transform_4, window_bounds = array<i64: 1, 64>}, {pipeline_mode = #tpu.pipeline_mode<synchronous>, transform_indices = @transform_5, window_bounds = array<i64: 64, 8>}, {pipeline_mode = #tpu.pipeline_mode<synchronous>, transform_indices = @transform_6, window_bounds = array<i64: 1, 8>}, {transform_indices = @transform_7, window_bounds = array<i64: 16, 8>}]} {
    %c0 = arith.constant 0 : index
    %c0_0 = arith.constant 0 : index
    %0 = vector.load %arg2[%c0, %c0_0] : memref<16x64xbf16, #tpu.memory_space<vmem>>, vector<16x64xbf16>
    %c0_1 = arith.constant 0 : index
    %c0_2 = arith.constant 0 : index
    %1 = vector.load %arg3[%c0_1, %c0_2] : memref<1x64xf32, #tpu.memory_space<vmem>>, vector<1x64xf32>
    %c0_3 = arith.constant 0 : index
    %c0_4 = arith.constant 0 : index
    %2 = vector.load %arg4[%c0_3, %c0_4] : memref<64x64xbf16, #tpu.memory_space<vmem>>, vector<64x64xbf16>
    %c0_5 = arith.constant 0 : index
    %c0_6 = arith.constant 0 : index
    %3 = vector.load %arg5[%c0_5, %c0_6] : memref<1x64xf32, #tpu.memory_space<vmem>>, vector<1x64xf32>
    %c0_7 = arith.constant 0 : index
    %c0_8 = arith.constant 0 : index
    %4 = vector.load %arg6[%c0_7, %c0_8] : memref<64x8xbf16, #tpu.memory_space<vmem>>, vector<64x8xbf16>
    %c0_9 = arith.constant 0 : index
    %c0_10 = arith.constant 0 : index
    %5 = vector.load %arg7[%c0_9, %c0_10] : memref<1x8xf32, #tpu.memory_space<vmem>>, vector<1x8xf32>
    %c0_11 = arith.constant 0 : index
    %c0_12 = arith.constant 0 : index
    %6 = vector.load %arg1[%c0_11, %c0_12] : memref<16x16xf32, #tpu.memory_space<vmem>>, vector<16x16xf32>
    %7 = arith.truncf %6 : vector<16x16xf32> to vector<16x16xbf16>
    %cst = arith.constant dense<0.000000e+00> : vector<16x64xf32>
    %8 = tpu.matmul %7, %0, %cst {dimension_numbers = #tpu.dot_dimension_numbers<[1], [0], [0], [1], [0, 0, 1, 1], [], []>} : vector<16x16xbf16>, vector<16x64xbf16>, vector<16x64xf32> -> vector<16x64xf32>
    %9 = vector.broadcast %1 : vector<1x64xf32> to vector<16x64xf32>
    %10 = arith.addf %8, %9 : vector<16x64xf32>
    %11 = math.tanh %10 : vector<16x64xf32>
    %12 = arith.truncf %11 : vector<16x64xf32> to vector<16x64xbf16>
    %cst_13 = arith.constant dense<0.000000e+00> : vector<16x64xf32>
    %13 = tpu.matmul %12, %2, %cst_13 {dimension_numbers = #tpu.dot_dimension_numbers<[1], [0], [0], [1], [0, 0, 1, 1], [], []>} : vector<16x64xbf16>, vector<64x64xbf16>, vector<16x64xf32> -> vector<16x64xf32>
    %14 = vector.broadcast %3 : vector<1x64xf32> to vector<16x64xf32>
    %15 = arith.addf %13, %14 : vector<16x64xf32>
    %16 = math.tanh %15 : vector<16x64xf32>
    %17 = arith.truncf %16 : vector<16x64xf32> to vector<16x64xbf16>
    %cst_14 = arith.constant dense<0.000000e+00> : vector<16x8xf32>
    %18 = tpu.matmul %17, %4, %cst_14 {dimension_numbers = #tpu.dot_dimension_numbers<[1], [0], [0], [1], [0, 0, 1, 1], [], []>} : vector<16x64xbf16>, vector<64x8xbf16>, vector<16x8xf32> -> vector<16x8xf32>
    %19 = vector.broadcast %5 : vector<1x8xf32> to vector<16x8xf32>
    %20 = arith.addf %18, %19 : vector<16x8xf32>
    %c0_15 = arith.constant 0 : index
    %c0_16 = arith.constant 0 : index
    %21 = vector.load %arg8[%c0_15, %c0_16] : memref<16x8xf32, #tpu.memory_space<vmem>>, vector<16x8xf32>
    tpu.vector_store %arg8[%c0_15, %c0_16], %20 {strides = array<i32>} : memref<16x8xf32, #tpu.memory_space<vmem>>, vector<16x8xf32>,
    return
  }
  func.func @transform_0(%arg0: i32) -> (i32, i32) {
    %c0_i32 = arith.constant 0 : i32
    %c0_i32_0 = arith.constant 0 : i32
    return %arg0, %c0_i32 : i32, i32
  }
  func.func @transform_1(%arg0: i32) -> (i32, i32) {
    %c0_i32 = arith.constant 0 : i32
    %c0_i32_0 = arith.constant 0 : i32
    %c0_i32_1 = arith.constant 0 : i32
    return %c0_i32, %c0_i32_0 : i32, i32
  }
  func.func @transform_2(%arg0: i32) -> (i32, i32) {
    %c0_i32 = arith.constant 0 : i32
    %c0_i32_0 = arith.constant 0 : i32
    %c0_i32_1 = arith.constant 0 : i32
    return %c0_i32, %c0_i32_0 : i32, i32
  }
  func.func @transform_3(%arg0: i32) -> (i32, i32) {
    %c0_i32 = arith.constant 0 : i32
    %c0_i32_0 = arith.constant 0 : i32
    %c0_i32_1 = arith.constant 0 : i32
    return %c0_i32, %c0_i32_0 : i32, i32
  }
  func.func @transform_4(%arg0: i32) -> (i32, i32) {
    %c0_i32 = arith.constant 0 : i32
    %c0_i32_0 = arith.constant 0 : i32
    %c0_i32_1 = arith.constant 0 : i32
    return %c0_i32, %c0_i32_0 : i32, i32
  }
  func.func @transform_5(%arg0: i32) -> (i32, i32) {
    %c0_i32 = arith.constant 0 : i32
    %c0_i32_0 = arith.constant 0 : i32
    %c0_i32_1 = arith.constant 0 : i32
    return %c0_i32, %c0_i32_0 : i32, i32
  }
  func.func @transform_6(%arg0: i32) -> (i32, i32) {
    %c0_i32 = arith.constant 0 : i32
    %c0_i32_0 = arith.constant 0 : i32
    %c0_i32_1 = arith.constant 0 : i32
    return %c0_i32, %c0_i32_0 : i32, i32
  }
  func.func @transform_7(%arg0: i32) -> (i32, i32) {
    %c0_i32 = arith.constant 0 : i32
    %c0_i32_0 = arith.constant 0 : i32
    return %arg0, %c0_i32 : i32, i32
  }
}

</mosaic_0001>

<bundles_post_ra>
// kernel: munet_forward.1
= control target key start
LH: loop header
LB: loop body
LE: loop exit
PB: predicated region body
PF: predicated region fallthrough
CT: control target
= control target key end

     0   :  { %12 = vsyncpa [#allocation3], 0  ;;  %s515_s0 = inlined_call_operand.hbm [shape: f32[16,16], index: 0, kind: input, shape index: {}]   ;;  %s516_s1 = inlined_call_operand.vmem [shape: bf16[16,64], index: 1, kind: input, shape index: {}]   ;;  %s517_s2 = inlined_call_operand.vmem [shape: f32[1,64], index: 2, kind: input, shape index: {}]   ;;  %s518_s3 = inlined_call_operand.vmem [shape: bf16[64,64], index: 3, kind: input, shape index: {}]   ;;  %s519_s4 = inlined_call_operand.vmem [shape: f32[1,64], index: 4, kind: input, shape index: {}]   ;;  %s520_s5 = inlined_call_operand.vmem [shape: bf16[64,8], index: 5, kind: input, shape index: {}]   ;;  %s521_s6 = inlined_call_operand.hbm [shape: f32[1,8], index: 6, kind: input, shape index: {}]   ;;  %s522_s7 = inlined_call_operand.vmem [shape: f32[16,8], index: 7, kind: output, shape index: {}]  }
   0x1   :  { %13 = vsyncpa [#allocation5], 0  ;;  %s422_s24 = smov [#allocation2]  }
   0x2   :  { %s19_s25 = sshll.u32 %s422_s24, 4  ;;  %s20_s25 = int_to_ptr.vmem [resolvable:$true] %s19_s25 }
   0x3   :  { %s386_s26 = scalar_lea.vmem %s20_s25, 256  ;;  %p391_p1 = scmp.lt.s32.totalorder %s20_s25, %s20_s25 }
   0x4   :  { %p387_p0 = scmp.ne.s32.totalorder %s20_s25, %s386_s26  ;;  %p392_p2 = scmp.lt.s32.totalorder %s386_s26, %s386_s26 }
   0x6   :  { %p393_p3 = por %p392_p2, %p391_p1 }
   0x8   :  { %p394_p4 = pnand %p393_p3, %p387_p0 }
   0xa   :  { %397 = shalt.err (!%p394_p4)
}
   0xb   :  { %s423_s27 = smov 128   ;;  %s424_s28 = smov 8  }
   0xc   :  { %25 = dma.hbm_to_vmem [thread:$0]  %s515_s0, 256, %s20_s25, [#allocation3], %s423_s27, %s423_s27, %s424_s28  }
   0xd   :  { %s425_s8 = smov [#allocation4]  }
   0xe   :  { %s42_s9 = sshll.u32 %s425_s8, 4  ;;  %s43_s9 = int_to_ptr.vmem [resolvable:$true] %s42_s9 }
   0xf   :  { %s406_s10 = scalar_lea.vmem %s43_s9, 16  ;;  %s410_s11 = scalar_lea.vmem %s43_s9, 32 }
  0x10   :  { %p407_p5 = scmp.ne.s32.totalorder %s43_s9, %s406_s10  ;;  %p411_p6 = scmp.lt.s32.totalorder %s43_s9, %s43_s9 }
  0x11   :  { %p412_p7 = scmp.lt.s32.totalorder %s410_s11, %s406_s10 }
  0x13   :  { %p413_p8 = por %p412_p7, %p411_p6 }
  0x15   :  { %p414_p9 = pnand %p413_p8, %p407_p5 }
  0x17   :  { %417 = shalt.err (!%p414_p9)
}
  0x18   :  { %45 = dma.hbm_to_vmem [thread:$0]  %s521_s6, 16, %s43_s9, [#allocation5]  }
  0x19   :  { %418 = dma.done.wait [#allocation3], 256  }
  0x1a   :  { %419 = vsyncadd [#allocation3], 4294967040 }
  0x1b   :  { %420 = dma.done.wait [#allocation5], 16  }
  0x1c   :  { %421 = vsyncadd [#allocation5], 4294967280  ;;  %v426_v0 = vmov 0.0   ;;  %vm427_vm0 = vmmov 0   ;;  %v361_v1 = vld [vmem:[%s516_s1] sm:$0xff]   ;;  %v75_v3 = vld [vmem:[#allocation2 + $0x8] sm:$0xff] }
  0x1d   :  { %325 = vmatprep.subr.bf16.mxu0 %v426_v0  ;;  %327 = vmatprep.mubr.msk.bf16.mxu0 %vm427_vm0, %v426_v0  ;;  %v74_v2 = vld [vmem:[#allocation2] sm:$0xff]  ;;  %vm89_vm1 = vcmask 130048   ;;  %v362_v5 = vld [vmem:[%s518_s3 + $0x18] sm:$0xff]   ;;  %v363_v6 = vld [vmem:[%s518_s3 + $0x10] sm:$0xff]   ;;  %vm167_vm2 = vcmask 523264   ;;  %vm289_vm3 = vcmask 64512  }
  0x1e   :  { %331 = vmatprep.subr.bf16.mxu1 %v426_v0  ;;  %339 = vmatprep.mubr.msk.bf16.mxu1 %vm427_vm0, %v426_v0  ;;  %v76_v4 = vpack.c.bf16 %v75_v3, %v74_v2  ;;  %v364_v7 = vld [vmem:[%s518_s3 + $0x8] sm:$0xff]   ;;  %v365_v8 = vld [vmem:[%s518_s3] sm:$0xff]   ;;  %v366_v19 = vld [vmem:[%s520_s5 + $0x18] sm:$0xff]  }
  0x1f   :  { %326 = vmatpush3.bf16.msra.mxu0 %v361_v1  ;;  %332 = vmatpush3.bf16.msra.mxu1 %v362_v5  ;;  %v298_v9 = vld [vmem:[%s517_s2] ss:$0 sm:$0xff]  ;;  %v367_v20 = vld [vmem:[%s520_s5 + $0x10] sm:$0xff]   ;;  %v368_v21 = vld [vmem:[%s520_s5 + $0x8] sm:$0xff]  }
  0x20   :  { %343 = vmatprep.subr.bf16.mxu0 %v426_v0  ;;  %333 = vmatprep.subr.bf16.mxu1 %v426_v0  ;;  %v369_v22 = vld [vmem:[%s520_s5] sm:$0xff]   ;;  %v307_v33 = vld [vmem:[#allocation4] ss:$0 sm:$0xff] }
  0x21   :  { %v301_v23 = vld [vmem:[%s519_s4] ss:$0 sm:$0xff] }
  0x22   :  { %328 = vmatmul.mubr.msk.bf16.vlgmr.msra.gmra.mxu0 %vm89_vm1, %v76_v4 }
  0x23   :  { %351 = vmatprep.mubr.msk.bf16.mxu0 %vm427_vm0, %v426_v0  ;;  %334 = vmatpush3.bf16.msra.mxu1 %v363_v6 }
  0x24   :  { %335 = vmatprep.subr.bf16.mxu1 %v426_v0  ;;  %344 = vmatpush3.bf16.msra.mxu0 %v366_v19 }
  0x25   :  { %345 = vmatprep.subr.bf16.mxu0 %v426_v0 }
  0x27   :  { %336 = vmatpush3.bf16.msra.mxu1 %v364_v7 }
  0x28   :  { %337 = vmatprep.subr.bf16.mxu1 %v426_v0  ;;  %346 = vmatpush3.bf16.msra.mxu0 %v367_v20 }
  0x29   :  { %347 = vmatprep.subr.bf16.mxu0 %v426_v0 }
  0x2b   :  { %338 = vmatpush3.bf16.msra.mxu1 %v365_v8 }
  0x2c   :  { %348 = vmatpush3.bf16.msra.mxu0 %v368_v21 }
  0x2d   :  { %349 = vmatprep.subr.bf16.mxu0 %v426_v0 }
  0x30   :  { %350 = vmatpush3.bf16.msra.mxu0 %v369_v22 }
  0xe2   :  { %v127_v10 = vpop.f32.mrf.mxu0 }
  0xe3   :  { %v128_v11 = vadd.f32 %v298_v9, %v127_v10 }
  0xe4   :  { %v329_v12 = vpop.f32.mrf.mxu0 }
  0xe5   :  { %370 = vtanh.f32 %v128_v11 }
  0xe6   :  { %v130_v13 = vpop.f32.mrf.mxu0 }
  0xe7   :  { %v131_v14 = vadd.f32 %v298_v9, %v130_v13 }
  0xe8   :  { %v330_v15 = vpop.f32.mrf.mxu0 }
  0xe9   :  { %372 = vtanh.f32 %v131_v14 }
  0xf2   :  { %v371_v16 = vpop.eup %370 }
  0xf6   :  { %v373_v17 = vpop.eup %372 }
  0xf7   :  { %v136_v18 = vpack.c.bf16 %v373_v17, %v371_v16 }
  0xf9   :  { %340 = vmatmul.mubr.msk.bf16.vlgmr.msra.gmra.mxu1 %vm167_vm2, %v136_v18 }
 0x1b9   :  { %v205_v24 = vpop.f32.mrf.mxu1 }
 0x1ba   :  { %v206_v25 = vadd.f32 %v301_v23, %v205_v24 }
 0x1bb   :  { %v341_v26 = vpop.f32.mrf.mxu1 }
 0x1bc   :  { %374 = vtanh.f32 %v206_v25 }
 0x1bd   :  { %v208_v27 = vpop.f32.mrf.mxu1 }
 0x1be   :  { %v209_v28 = vadd.f32 %v301_v23, %v208_v27 }
 0x1bf   :  { %v342_v29 = vpop.f32.mrf.mxu1 }
 0x1c0   :  { %376 = vtanh.f32 %v209_v28 }
 0x1c9   :  { %v375_v30 = vpop.eup %374 }
 0x1cd   :  { %v377_v31 = vpop.eup %376 }
 0x1ce   :  { %v214_v32 = vpack.c.bf16 %v377_v31, %v375_v30 }
 0x1d0   :  { %352 = vmatmul.mubr.msk.bf16.vlgmr.msra.gmra.mxu0 %vm167_vm2, %v214_v32 }
 0x290   :  { %v282_v34 = vpop.f32.mrf.mxu0 }
 0x291   :  { %v283_v35 = vadd.f32 %v307_v33, %v282_v34 }
 0x292   :  { %v353_v36 = vpop.f32.mrf.mxu0 }
 0x293   :  { %290 = vst.msk [vmem:[%s522_s7] sm:$0xff] %vm289_vm3, %v283_v35 }
 0x294   :  { %v285_v37 = vpop.f32.mrf.mxu0 }
 0x295   :  { %v286_v38 = vadd.f32 %v307_v33, %v285_v37 }
 0x296   :  { %v354_v39 = vpop.f32.mrf.mxu0 }
 0x297   :  { %291 = vst.msk [vmem:[%s522_s7 + $0x8] sm:$0xff] %vm289_vm3, %v286_v38 }
 0x298   :  { %296 = vsyncpa [#allocation3], 1 }
 0x299   :  { %297 = vsyncpa [#allocation5], 1 }

</bundles_post_ra>
